<compile_context>
chip_gen: v7x
topology: tpu7x:2x2x1
jax: 0.10.0
libtpu: 0.0.40
codegen_flags: <defaults>
</compile_context>

<pallas_src>
import numpy as np
import jax
import jax.numpy as jnp
from jax.experimental import pallas as pl
from jax.experimental.pallas import tpu as pltpu

KSIZE = 3
_MXU_MIN_CIN = 32                    # below this the MXU contraction is degenerate
_VMEM_BUDGET = 24 * 1024 * 1024      # conservative across v5e / v6e / v7x scoped VMEM


def _pick_co_tile(c_out, c_in, hw, act_bytes):
    """Largest C_out tile (divisor of C_out; full or a multiple of 8 to stay
    (8,128)-friendly) whose double-buffered blocks fit the VMEM budget."""
    fitting = []
    for t in range(1, c_out + 1):
        if c_out % t:
            continue
        if t != c_out and t % 8:
            continue
        need = (2 * c_in * hw * act_bytes          # input block (double-buffered)
                + 2 * t * hw * act_bytes           # output block
                + t * hw * 4                       # f32 accumulator
                + 2 * KSIZE * KSIZE * t * c_in * act_bytes   # weights
                + 2 * KSIZE * KSIZE * hw * act_bytes         # halo masks
                + 2 * t * 4)                       # folded BN shift
        if need <= _VMEM_BUDGET:
            fitting.append(t)
    if fitting:
        return max(fitting)
    # TODO(synk): for images where even tile_co=8 exceeds the budget, add H-row
    # tiling with an explicit halo exchange.
    return 8 if c_out % 8 == 0 else c_out


def _halo_masks(h, w, dtype):
    """(9, H*W) multiplicative masks zeroing the wrapped rows/cols of each tap."""
    hw = h * w
    m = np.zeros((KSIZE * KSIZE, h, w), np.float32)
    for kh in range(KSIZE):
        for kw in range(KSIZE):
            dh, dw = kh - 1, kw - 1
            h0, h1 = max(0, -dh), min(h, h - dh)
            w0, w1 = max(0, -dw), min(w, w - dw)
            m[kh * KSIZE + kw, h0:h1, w0:w1] = 1.0
    return jnp.asarray(m.reshape(KSIZE * KSIZE, hw), dtype=dtype)


def luconv_forward(x, conv_w, conv_b, bn_gamma, bn_beta, bn_mean, bn_var, *, eps=1e-5):
    """relu(batchnorm(conv3x3(x))), NCHW in / NCHW out, output in x.dtype."""
    # TODO(synk): training-mode BatchNorm2d (batch statistics + running-stat
    # updates) is not implemented; eval-mode running stats are folded in.
    n, c_in, h, w = x.shape
    c_out = conv_w.shape[0]
    hw = h * w
    act_dtype = x.dtype
    act_bytes = x.dtype.itemsize

    # Fold eval-mode BN (+ conv bias) into per-output-channel scale & shift.
    scale = (bn_gamma / jnp.sqrt(bn_var + eps)).astype(jnp.float32)        # (C_out,)
    shift = (bn_beta + scale * (conv_b - bn_mean)).astype(jnp.float32)     # (C_out,)

    # (C_out, C_in, 3, 3) -> (9, C_out, C_in), BN scale folded, activation dtype.
    w_folded = conv_w.astype(jnp.float32) * scale[:, None, None, None]
    w_taps = jnp.transpose(w_folded, (2, 3, 0, 1)).reshape(KSIZE * KSIZE, c_out, c_in)
    w_taps = w_taps.astype(act_dtype)
    shift_col = shift.reshape(c_out, 1)                                    # f32

    masks = _halo_masks(h, w, act_dtype)                                   # (9, HW)
    x_flat = x.reshape(n, c_in, hw)        # free reshape: native dtype, no pad copy

    tile_co = _pick_co_tile(c_out, c_in, hw, act_bytes)
    n_co = c_out // tile_co
    use_mxu = c_in >= _MXU_MIN_CIN

    def kernel(w_ref, shift_ref, mask_ref, x_ref, o_ref):
        x_slab = x_ref[0]                      # (C_in, HW), native dtype
        all_masks = mask_ref[...]              # (9, HW)
        acc = jnp.zeros((tile_co, hw), jnp.float32)
        for kh in range(KSIZE):
            for kw in range(KSIZE):
                k = kh * KSIZE + kw
                dh, dw = kh - 1, kw - 1
                s = dh * w + dw                # flat-index offset of this tap
                # Halo shift = lane rotation of the flattened image (XLU work),
                # wrapped rows/cols zeroed by the precomputed mask.
                if s == 0:
                    term = x_slab
                else:
                    shifted = pltpu.roll(x_slab, shift=(-s) % hw, axis=1)
                    term = shifted * all_masks[k:k + 1, :]
                w_k = w_ref[k]                 # (tile_co, C_in)
                if use_mxu:
                    # Shift-and-matmul: (tile_co, C_in) @ (C_in, HW) on the MXU.
                    acc = acc + jnp.dot(w_k, term, preferred_element_type=jnp.float32)
                else:
                    # Tiny C_in: VPU outer-product FMAs (avoid degenerate MXU K).
                    w32 = w_k.astype(jnp.float32)
                    t32 = term.astype(jnp.float32)
                    for ci in range(c_in):
                        acc = acc + w32[:, ci:ci + 1] * t32[ci:ci + 1, :]
        out = jnp.maximum(acc + shift_ref[...], 0.0)       # BN shift + ReLU (f32)
        o_ref[0] = out.astype(o_ref.dtype)

    # Per-step VMEM footprint; only override the scoped limit when needed so the
    # same code stays within v7x's smaller VMEM and v5e's smaller default.
    block_bytes = (2 * c_in * hw * act_bytes + 2 * tile_co * hw * act_bytes
                   + tile_co * hw * 4
                   + 2 * KSIZE * KSIZE * tile_co * c_in * act_bytes
                   + 2 * KSIZE * KSIZE * hw * act_bytes + 2 * tile_co * 4)
    vmem_limit = None
    if block_bytes > 12 * 1024 * 1024:
        vmem_limit = min(2 * block_bytes, 64 * 1024 * 1024)

    flops = 2 * n * c_out * hw * c_in * KSIZE * KSIZE
    bytes_accessed = int(x_flat.size * act_bytes + n * c_out * hw * act_bytes
                         + w_taps.size * act_bytes + masks.size * act_bytes
                         + shift_col.size * 4)

    out_flat = pl.pallas_call(
        kernel,
        out_shape=jax.ShapeDtypeStruct((n, c_out, hw), act_dtype),
        grid=(n, n_co),
        in_specs=[
            pl.BlockSpec((KSIZE * KSIZE, tile_co, c_in), lambda b, c: (0, c, 0)),  # weights
            pl.BlockSpec((tile_co, 1), lambda b, c: (c, 0)),                       # BN shift
            pl.BlockSpec((KSIZE * KSIZE, hw), lambda b, c: (0, 0)),                # halo masks
            pl.BlockSpec((1, c_in, hw), lambda b, c: (b, 0, 0)),                   # activations
        ],
        out_specs=pl.BlockSpec((1, tile_co, hw), lambda b, c: (b, c, 0)),
        compiler_params=pltpu.CompilerParams(
            dimension_semantics=("parallel", "parallel"),
            vmem_limit_bytes=vmem_limit,
        ),
        cost_estimate=pl.CostEstimate(
            flops=flops, transcendentals=0, bytes_accessed=bytes_accessed),
    )(w_taps, shift_col, masks, x_flat)

    return out_flat.reshape(n, c_out, h, w)


if __name__ == "__main__":
    key = jax.random.PRNGKey(0)
    kx, kw, kb, kg, kbt, km, kv = jax.random.split(key, 7)

    batch, in_channels, out_channels, spatial = 2, 4, 8, 16

    x = jax.random.normal(kx, (batch, in_channels, spatial, spatial), jnp.float32)
    conv_w = jax.random.normal(kw, (out_channels, in_channels, 3, 3), jnp.float32) * 0.1
    conv_b = jax.random.normal(kb, (out_channels,), jnp.float32) * 0.1
    bn_gamma = 1.0 + 0.1 * jax.random.normal(kg, (out_channels,), jnp.float32)
    bn_beta = 0.1 * jax.random.normal(kbt, (out_channels,), jnp.float32)
    bn_mean = 0.1 * jax.random.normal(km, (out_channels,), jnp.float32)
    bn_var = jax.random.uniform(kv, (out_channels,), jnp.float32, 0.5, 1.5)

    out = luconv_forward(x, conv_w, conv_b, bn_gamma, bn_beta, bn_mean, bn_var)
    out = jax.block_until_ready(out)

    # Plain-JAX reference (same math as the PyTorch eval-mode forward).
    eps = 1e-5
    conv = jax.lax.conv_general_dilated(
        x, conv_w, window_strides=(1, 1), padding=((1, 1), (1, 1)),
        dimension_numbers=("NCHW", "OIHW", "NCHW"))
    conv = conv + conv_b[None, :, None, None]
    bn = (bn_gamma[None, :, None, None] * (conv - bn_mean[None, :, None, None])
          / jnp.sqrt(bn_var[None, :, None, None] + eps)
          + bn_beta[None, :, None, None])
    ref = jnp.maximum(bn, 0.0)

    assert out.shape == (batch, out_channels, spatial, spatial)
    max_err = float(jnp.max(jnp.abs(out - ref)))
    assert jnp.allclose(out, ref, atol=1e-4, rtol=1e-4), max_err

    print("KERNEL_OK")
</pallas_src>

<mosaic_0001>
module attributes {stable_mosaic.version = 11 : i64} {
  func.func @kernel(%arg0: i32, %arg1: i32, %arg2: memref<9x8x4xf32, #tpu.memory_space<vmem>>, %arg3: memref<8x1xf32, #tpu.memory_space<vmem>>, %arg4: memref<9x256xf32, #tpu.memory_space<vmem>>, %arg5: memref<1x4x256xf32, #tpu.memory_space<vmem>>, %arg6: memref<1x8x256xf32, #tpu.memory_space<vmem>>) attributes {dimension_semantics = [#tpu.dimension_semantics<parallel>, #tpu.dimension_semantics<parallel>], iteration_bounds = array<i64: 2, 1>, scalar_prefetch = 0 : i64, scratch_operands = 0 : i64, tpu.core_type = #tpu.core_type<tc>, window_params = [{transform_indices = @transform_0, window_bounds = array<i64: 9, 8, 4>}, {transform_indices = @transform_1, window_bounds = array<i64: 8, 1>}, {pipeline_mode = #tpu.pipeline_mode<synchronous>, transform_indices = @transform_2, window_bounds = array<i64: 9, 256>}, {transform_indices = @transform_3, window_bounds = array<i64: 1, 4, 256>}, {transform_indices = @transform_4, window_bounds = array<i64: 1, 8, 256>}]} {
    %c0 = arith.constant 0 : index
    %c0_0 = arith.constant 0 : index
    %c0_1 = arith.constant 0 : index
    %0 = vector.load %arg5[%c0, %c0_0, %c0_1] : memref<1x4x256xf32, #tpu.memory_space<vmem>>, vector<1x4x256xf32>
    %1 = vector.shape_cast %0 : vector<1x4x256xf32> to vector<4x256xf32>
    %c0_2 = arith.constant 0 : index
    %c0_3 = arith.constant 0 : index
    %2 = vector.load %arg4[%c0_2, %c0_3] : memref<9x256xf32, #tpu.memory_space<vmem>>, vector<9x256xf32>
    %cst = arith.constant 0.000000e+00 : f32
    %3 = vector.broadcast %cst : f32 to vector<8x256xf32>
    %c17_i32 = arith.constant 17 : i32
    %4 = tpu.dynamic_rotate %1 by %c17_i32 dim 1 : vector<4x256xf32>, i32 -> vector<4x256xf32>
    %5 = vector.extract_strided_slice %2 {offsets = [0, 0], sizes = [1, 256], strides = [1, 1]} : vector<9x256xf32> to vector<1x256xf32>
    %6 = vector.broadcast %5 : vector<1x256xf32> to vector<4x256xf32>
    %7 = arith.mulf %4, %6 : vector<4x256xf32>
    %c0_4 = arith.constant 0 : index
    %c0_5 = arith.constant 0 : index
    %c0_6 = arith.constant 0 : index
    %8 = vector.load %arg2[%c0_4, %c0_5, %c0_6] : memref<9x8x4xf32, #tpu.memory_space<vmem>>, vector<1x8x4xf32>
    %9 = vector.shape_cast %8 : vector<1x8x4xf32> to vector<8x4xf32>
    %10 = vector.extract_strided_slice %9 {offsets = [0, 0], sizes = [8, 1], strides = [1, 1]} : vector<8x4xf32> to vector<8x1xf32>
    %11 = vector.extract_strided_slice %7 {offsets = [0, 0], sizes = [1, 256], strides = [1, 1]} : vector<4x256xf32> to vector<1x256xf32>
    %12 = vector.broadcast %10 : vector<8x1xf32> to vector<8x256xf32>
    %13 = vector.broadcast %11 : vector<1x256xf32> to vector<8x256xf32>
    %14 = arith.mulf %12, %13 : vector<8x256xf32>
    %15 = arith.addf %3, %14 : vector<8x256xf32>
    %16 = vector.extract_strided_slice %9 {offsets = [0, 1], sizes = [8, 1], strides = [1, 1]} : vector<8x4xf32> to vector<8x1xf32>
    %17 = vector.extract_strided_slice %7 {offsets = [1, 0], sizes = [1, 256], strides = [1, 1]} : vector<4x256xf32> to vector<1x256xf32>
    %18 = vector.broadcast %16 : vector<8x1xf32> to vector<8x256xf32>
    %19 = vector.broadcast %17 : vector<1x256xf32> to vector<8x256xf32>
    %20 = arith.mulf %18, %19 : vector<8x256xf32>
    %21 = arith.addf %15, %20 : vector<8x256xf32>
    %22 = vector.extract_strided_slice %9 {offsets = [0, 2], sizes = [8, 1], strides = [1, 1]} : vector<8x4xf32> to vector<8x1xf32>
    %23 = vector.extract_strided_slice %7 {offsets = [2, 0], sizes = [1, 256], strides = [1, 1]} : vector<4x256xf32> to vector<1x256xf32>
    %24 = vector.broadcast %22 : vector<8x1xf32> to vector<8x256xf32>
    %25 = vector.broadcast %23 : vector<1x256xf32> to vector<8x256xf32>
    %26 = arith.mulf %24, %25 : vector<8x256xf32>
    %27 = arith.addf %21, %26 : vector<8x256xf32>
    %28 = vector.extract_strided_slice %9 {offsets = [0, 3], sizes = [8, 1], strides = [1, 1]} : vector<8x4xf32> to vector<8x1xf32>
    %29 = vector.extract_strided_slice %7 {offsets = [3, 0], sizes = [1, 256], strides = [1, 1]} : vector<4x256xf32> to vector<1x256xf32>
    %30 = vector.broadcast %28 : vector<8x1xf32> to vector<8x256xf32>
    %31 = vector.broadcast %29 : vector<1x256xf32> to vector<8x256xf32>
    %32 = arith.mulf %30, %31 : vector<8x256xf32>
    %33 = arith.addf %27, %32 : vector<8x256xf32>
    %c16_i32 = arith.constant 16 : i32
    %34 = tpu.dynamic_rotate %1 by %c16_i32 dim 1 : vector<4x256xf32>, i32 -> vector<4x256xf32>
    %35 = vector.extract_strided_slice %2 {offsets = [1, 0], sizes = [1, 256], strides = [1, 1]} : vector<9x256xf32> to vector<1x256xf32>
    %36 = vector.broadcast %35 : vector<1x256xf32> to vector<4x256xf32>
    %37 = arith.mulf %34, %36 : vector<4x256xf32>
    %c1 = arith.constant 1 : index
    %c0_7 = arith.constant 0 : index
    %c0_8 = arith.constant 0 : index
    %38 = vector.load %arg2[%c1, %c0_7, %c0_8] : memref<9x8x4xf32, #tpu.memory_space<vmem>>, vector<1x8x4xf32>
    %39 = vector.shape_cast %38 : vector<1x8x4xf32> to vector<8x4xf32>
    %40 = vector.extract_strided_slice %39 {offsets = [0, 0], sizes = [8, 1], strides = [1, 1]} : vector<8x4xf32> to vector<8x1xf32>
    %41 = vector.extract_strided_slice %37 {offsets = [0, 0], sizes = [1, 256], strides = [1, 1]} : vector<4x256xf32> to vector<1x256xf32>
    %42 = vector.broadcast %40 : vector<8x1xf32> to vector<8x256xf32>
    %43 = vector.broadcast %41 : vector<1x256xf32> to vector<8x256xf32>
    %44 = arith.mulf %42, %43 : vector<8x256xf32>
    %45 = arith.addf %33, %44 : vector<8x256xf32>
    %46 = vector.extract_strided_slice %39 {offsets = [0, 1], sizes = [8, 1], strides = [1, 1]} : vector<8x4xf32> to vector<8x1xf32>
    %47 = vector.extract_strided_slice %37 {offsets = [1, 0], sizes = [1, 256], strides = [1, 1]} : vector<4x256xf32> to vector<1x256xf32>
    %48 = vector.broadcast %46 : vector<8x1xf32> to vector<8x256xf32>
    %49 = vector.broadcast %47 : vector<1x256xf32> to vector<8x256xf32>
    %50 = arith.mulf %48, %49 : vector<8x256xf32>
    %51 = arith.addf %45, %50 : vector<8x256xf32>
    %52 = vector.extract_strided_slice %39 {offsets = [0, 2], sizes = [8, 1], strides = [1, 1]} : vector<8x4xf32> to vector<8x1xf32>
    %53 = vector.extract_strided_slice %37 {offsets = [2, 0], sizes = [1, 256], strides = [1, 1]} : vector<4x256xf32> to vector<1x256xf32>
    %54 = vector.broadcast %52 : vector<8x1xf32> to vector<8x256xf32>
    %55 = vector.broadcast %53 : vector<1x256xf32> to vector<8x256xf32>
    %56 = arith.mulf %54, %55 : vector<8x256xf32>
    %57 = arith.addf %51, %56 : vector<8x256xf32>
    %58 = vector.extract_strided_slice %39 {offsets = [0, 3], sizes = [8, 1], strides = [1, 1]} : vector<8x4xf32> to vector<8x1xf32>
    %59 = vector.extract_strided_slice %37 {offsets = [3, 0], sizes = [1, 256], strides = [1, 1]} : vector<4x256xf32> to vector<1x256xf32>
    %60 = vector.broadcast %58 : vector<8x1xf32> to vector<8x256xf32>
    %61 = vector.broadcast %59 : vector<1x256xf32> to vector<8x256xf32>
    %62 = arith.mulf %60, %61 : vector<8x256xf32>
    %63 = arith.addf %57, %62 : vector<8x256xf32>
    %c15_i32 = arith.constant 15 : i32
    %64 = tpu.dynamic_rotate %1 by %c15_i32 dim 1 : vector<4x256xf32>, i32 -> vector<4x256xf32>
    %65 = vector.extract_strided_slice %2 {offsets = [2, 0], sizes = [1, 256], strides = [1, 1]} : vector<9x256xf32> to vector<1x256xf32>
    %66 = vector.broadcast %65 : vector<1x256xf32> to vector<4x256xf32>
    %67 = arith.mulf %64, %66 : vector<4x256xf32>
    %c2 = arith.constant 2 : index
    %c0_9 = arith.constant 0 : index
    %c0_10 = arith.constant 0 : index
    %68 = vector.load %arg2[%c2, %c0_9, %c0_10] : memref<9x8x4xf32, #tpu.memory_space<vmem>>, vector<1x8x4xf32>
    %69 = vector.shape_cast %68 : vector<1x8x4xf32> to vector<8x4xf32>
    %70 = vector.extract_strided_slice %69 {offsets = [0, 0], sizes = [8, 1], strides = [1, 1]} : vector<8x4xf32> to vector<8x1xf32>
    %71 = vector.extract_strided_slice %67 {offsets = [0, 0], sizes = [1, 256], strides = [1, 1]} : vector<4x256xf32> to vector<1x256xf32>
    %72 = vector.broadcast %70 : vector<8x1xf32> to vector<8x256xf32>
    %73 = vector.broadcast %71 : vector<1x256xf32> to vector<8x256xf32>
    %74 = arith.mulf %72, %73 : vector<8x256xf32>
    %75 = arith.addf %63, %74 : vector<8x256xf32>
    %76 = vector.extract_strided_slice %69 {offsets = [0, 1], sizes = [8, 1], strides = [1, 1]} : vector<8x4xf32> to vector<8x1xf32>
    %77 = vector.extract_strided_slice %67 {offsets = [1, 0], sizes = [1, 256], strides = [1, 1]} : vector<4x256xf32> to vector<1x256xf32>
    %78 = vector.broadcast %76 : vector<8x1xf32> to vector<8x256xf32>
    %79 = vector.broadcast %77 : vector<1x256xf32> to vector<8x256xf32>
    %80 = arith.mulf %78, %79 : vector<8x256xf32>
    %81 = arith.addf %75, %80 : vector<8x256xf32>
    %82 = vector.extract_strided_slice %69 {offsets = [0, 2], sizes = [8, 1], strides = [1, 1]} : vector<8x4xf32> to vector<8x1xf32>
    %83 = vector.extract_strided_slice %67 {offsets = [2, 0], sizes = [1, 256], strides = [1, 1]} : vector<4x256xf32> to vector<1x256xf32>
    %84 = vector.broadcast %82 : vector<8x1xf32> to vector<8x256xf32>
    %85 = vector.broadcast %83 : vector<1x256xf32> to vector<8x256xf32>
    %86 = arith.mulf %84, %85 : vector<8x256xf32>
    %87 = arith.addf %81, %86 : vector<8x256xf32>
    %88 = vector.extract_strided_slice %69 {offsets = [0, 3], sizes = [8, 1], strides = [1, 1]} : vector<8x4xf32> to vector<8x1xf32>
    %89 = vector.extract_strided_slice %67 {offsets = [3, 0], sizes = [1, 256], strides = [1, 1]} : vector<4x256xf32> to vector<1x256xf32>
    %90 = vector.broadcast %88 : vector<8x1xf32> to vector<8x256xf32>
    %91 = vector.broadcast %89 : vector<1x256xf32> to vector<8x256xf32>
    %92 = arith.mulf %90, %91 : vector<8x256xf32>
    %93 = arith.addf %87, %92 : vector<8x256xf32>
    %c1_i32 = arith.constant 1 : i32
    %94 = tpu.dynamic_rotate %1 by %c1_i32 dim 1 : vector<4x256xf32>, i32 -> vector<4x256xf32>
    %95 = vector.extract_strided_slice %2 {offsets = [3, 0], sizes = [1, 256], strides = [1, 1]} : vector<9x256xf32> to vector<1x256xf32>
    %96 = vector.broadcast %95 : vector<1x256xf32> to vector<4x256xf32>
    %97 = arith.mulf %94, %96 : vector<4x256xf32>
    %c3 = arith.constant 3 : index
    %c0_11 = arith.constant 0 : index
    %c0_12 = arith.constant 0 : index
    %98 = vector.load %arg2[%c3, %c0_11, %c0_12] : memref<9x8x4xf32, #tpu.memory_space<vmem>>, vector<1x8x4xf32>
    %99 = vector.shape_cast %98 : vector<1x8x4xf32> to vector<8x4xf32>
    %100 = vector.extract_strided_slice %99 {offsets = [0, 0], sizes = [8, 1], strides = [1, 1]} : vector<8x4xf32> to vector<8x1xf32>
    %101 = vector.extract_strided_slice %97 {offsets = [0, 0], sizes = [1, 256], strides = [1, 1]} : vector<4x256xf32> to vector<1x256xf32>
    %102 = vector.broadcast %100 : vector<8x1xf32> to vector<8x256xf32>
    %103 = vector.broadcast %101 : vector<1x256xf32> to vector<8x256xf32>
    %104 = arith.mulf %102, %103 : vector<8x256xf32>
    %105 = arith.addf %93, %104 : vector<8x256xf32>
    %106 = vector.extract_strided_slice %99 {offsets = [0, 1], sizes = [8, 1], strides = [1, 1]} : vector<8x4xf32> to vector<8x1xf32>
    %107 = vector.extract_strided_slice %97 {offsets = [1, 0], sizes = [1, 256], strides = [1, 1]} : vector<4x256xf32> to vector<1x256xf32>
    %108 = vector.broadcast %106 : vector<8x1xf32> to vector<8x256xf32>
    %109 = vector.broadcast %107 : vector<1x256xf32> to vector<8x256xf32>
    %110 = arith.mulf %108, %109 : vector<8x256xf32>
    %111 = arith.addf %105, %110 : vector<8x256xf32>
    %112 = vector.extract_strided_slice %99 {offsets = [0, 2], sizes = [8, 1], strides = [1, 1]} : vector<8x4xf32> to vector<8x1xf32>
    %113 = vector.extract_strided_slice %97 {offsets = [2, 0], sizes = [1, 256], strides = [1, 1]} : vector<4x256xf32> to vector<1x256xf32>
    %114 = vector.broadcast %112 : vector<8x1xf32> to vector<8x256xf32>
    %115 = vector.broadcast %113 : vector<1x256xf32> to vector<8x256xf32>
    %116 = arith.mulf %114, %115 : vector<8x256xf32>
    %117 = arith.addf %111, %116 : vector<8x256xf32>
    %118 = vector.extract_strided_slice %99 {offsets = [0, 3], sizes = [8, 1], strides = [1, 1]} : vector<8x4xf32> to vector<8x1xf32>
    %119 = vector.extract_strided_slice %97 {offsets = [3, 0], sizes = [1, 256], strides = [1, 1]} : vector<4x256xf32> to vector<1x256xf32>
    %120 = vector.broadcast %118 : vector<8x1xf32> to vector<8x256xf32>
    %121 = vector.broadcast %119 : vector<1x256xf32> to vector<8x256xf32>
    %122 = arith.mulf %120, %121 : vector<8x256xf32>
    %123 = arith.addf %117, %122 : vector<8x256xf32>
    %c4 = arith.constant 4 : index
    %c0_13 = arith.constant 0 : index
    %c0_14 = arith.constant 0 : index
    %124 = vector.load %arg2[%c4, %c0_13, %c0_14] : memref<9x8x4xf32, #tpu.memory_space<vmem>>, vector<1x8x4xf32>
    %125 = vector.shape_cast %124 : vector<1x8x4xf32> to vector<8x4xf32>
    %126 = vector.extract_strided_slice %125 {offsets = [0, 0], sizes = [8, 1], strides = [1, 1]} : vector<8x4xf32> to vector<8x1xf32>
    %127 = vector.extract_strided_slice %1 {offsets = [0, 0], sizes = [1, 256], strides = [1, 1]} : vector<4x256xf32> to vector<1x256xf32>
    %128 = vector.broadcast %126 : vector<8x1xf32> to vector<8x256xf32>
    %129 = vector.broadcast %127 : vector<1x256xf32> to vector<8x256xf32>
    %130 = arith.mulf %128, %129 : vector<8x256xf32>
    %131 = arith.addf %123, %130 : vector<8x256xf32>
    %132 = vector.extract_strided_slice %125 {offsets = [0, 1], sizes = [8, 1], strides = [1, 1]} : vector<8x4xf32> to vector<8x1xf32>
    %133 = vector.extract_strided_slice %1 {offsets = [1, 0], sizes = [1, 256], strides = [1, 1]} : vector<4x256xf32> to vector<1x256xf32>
    %134 = vector.broadcast %132 : vector<8x1xf32> to vector<8x256xf32>
    %135 = vector.broadcast %133 : vector<1x256xf32> to vector<8x256xf32>
    %136 = arith.mulf %134, %135 : vector<8x256xf32>
    %137 = arith.addf %131, %136 : vector<8x256xf32>
    %138 = vector.extract_strided_slice %125 {offsets = [0, 2], sizes = [8, 1], strides = [1, 1]} : vector<8x4xf32> to vector<8x1xf32>
    %139 = vector.extract_strided_slice %1 {offsets = [2, 0], sizes = [1, 256], strides = [1, 1]} : vector<4x256xf32> to vector<1x256xf32>
    %140 = vector.broadcast %138 : vector<8x1xf32> to vector<8x256xf32>
    %141 = vector.broadcast %139 : vector<1x256xf32> to vector<8x256xf32>
    %142 = arith.mulf %140, %141 : vector<8x256xf32>
    %143 = arith.addf %137, %142 : vector<8x256xf32>
    %144 = vector.extract_strided_slice %125 {offsets = [0, 3], sizes = [8, 1], strides = [1, 1]} : vector<8x4xf32> to vector<8x1xf32>
    %145 = vector.extract_strided_slice %1 {offsets = [3, 0], sizes = [1, 256], strides = [1, 1]} : vector<4x256xf32> to vector<1x256xf32>
    %146 = vector.broadcast %144 : vector<8x1xf32> to vector<8x256xf32>
    %147 = vector.broadcast %145 : vector<1x256xf32> to vector<8x256xf32>
    %148 = arith.mulf %146, %147 : vector<8x256xf32>
    %149 = arith.addf %143, %148 : vector<8x256xf32>
    %c255_i32 = arith.constant 255 : i32
    %150 = tpu.dynamic_rotate %1 by %c255_i32 dim 1 : vector<4x256xf32>, i32 -> vector<4x256xf32>
    %151 = vector.extract_strided_slice %2 {offsets = [5, 0], sizes = [1, 256], strides = [1, 1]} : vector<9x256xf32> to vector<1x256xf32>
    %152 = vector.broadcast %151 : vector<1x256xf32> to vector<4x256xf32>
    %153 = arith.mulf %150, %152 : vector<4x256xf32>
    %c5 = arith.constant 5 : index
    %c0_15 = arith.constant 0 : index
    %c0_16 = arith.constant 0 : index
    %154 = vector.load %arg2[%c5, %c0_15, %c0_16] : memref<9x8x4xf32, #tpu.memory_space<vmem>>, vector<1x8x4xf32>
    %155 = vector.shape_cast %154 : vector<1x8x4xf32> to vector<8x4xf32>
    %156 = vector.extract_strided_slice %155 {offsets = [0, 0], sizes = [8, 1], strides = [1, 1]} : vector<8x4xf32> to vector<8x1xf32>
    %157 = vector.extract_strided_slice %153 {offsets = [0, 0], sizes = [1, 256], strides = [1, 1]} : vector<4x256xf32> to vector<1x256xf32>
    %158 = vector.broadcast %156 : vector<8x1xf32> to vector<8x256xf32>
    %159 = vector.broadcast %157 : vector<1x256xf32> to vector<8x256xf32>
    %160 = arith.mulf %158, %159 : vector<8x256xf32>
    %161 = arith.addf %149, %160 : vector<8x256xf32>
    %162 = vector.extract_strided_slice %155 {offsets = [0, 1], sizes = [8, 1], strides = [1, 1]} : vector<8x4xf32> to vector<8x1xf32>
    %163 = vector.extract_strided_slice %153 {offsets = [1, 0], sizes = [1, 256], strides = [1, 1]} : vector<4x256xf32> to vector<1x256xf32>
    %164 = vector.broadcast %162 : vector<8x1xf32> to vector<8x256xf32>
    %165 = vector.broadcast %163 : vector<1x256xf32> to vector<8x256xf32>
    %166 = arith.mulf %164, %165 : vector<8x256xf32>
    %167 = arith.addf %161, %166 : vector<8x256xf32>
    %168 = vector.extract_strided_slice %155 {offsets = [0, 2], sizes = [8, 1], strides = [1, 1]} : vector<8x4xf32> to vector<8x1xf32>
    %169 = vector.extract_strided_slice %153 {offsets = [2, 0], sizes = [1, 256], strides = [1, 1]} : vector<4x256xf32> to vector<1x256xf32>
    %170 = vector.broadcast %168 : vector<8x1xf32> to vector<8x256xf32>
    %171 = vector.broadcast %169 : vector<1x256xf32> to vector<8x256xf32>
    %172 = arith.mulf %170, %171 : vector<8x256xf32>
    %173 = arith.addf %167, %172 : vector<8x256xf32>
    %174 = vector.extract_strided_slice %155 {offsets = [0, 3], sizes = [8, 1], strides = [1, 1]} : vector<8x4xf32> to vector<8x1xf32>
    %175 = vector.extract_strided_slice %153 {offsets = [3, 0], sizes = [1, 256], strides = [1, 1]} : vector<4x256xf32> to vector<1x256xf32>
    %176 = vector.broadcast %174 : vector<8x1xf32> to vector<8x256xf32>
    %177 = vector.broadcast %175 : vector<1x256xf32> to vector<8x256xf32>
    %178 = arith.mulf %176, %177 : vector<8x256xf32>
    %179 = arith.addf %173, %178 : vector<8x256xf32>
    %c241_i32 = arith.constant 241 : i32
    %180 = tpu.dynamic_rotate %1 by %c241_i32 dim 1 : vector<4x256xf32>, i32 -> vector<4x256xf32>
    %181 = vector.extract_strided_slice %2 {offsets = [6, 0], sizes = [1, 256], strides = [1, 1]} : vector<9x256xf32> to vector<1x256xf32>
    %182 = vector.broadcast %181 : vector<1x256xf32> to vector<4x256xf32>
    %183 = arith.mulf %180, %182 : vector<4x256xf32>
    %c6 = arith.constant 6 : index
    %c0_17 = arith.constant 0 : index
    %c0_18 = arith.constant 0 : index
    %184 = vector.load %arg2[%c6, %c0_17, %c0_18] : memref<9x8x4xf32, #tpu.memory_space<vmem>>, vector<1x8x4xf32>
    %185 = vector.shape_cast %184 : vector<1x8x4xf32> to vector<8x4xf32>
    %186 = vector.extract_strided_slice %185 {offsets = [0, 0], sizes = [8, 1], strides = [1, 1]} : vector<8x4xf32> to vector<8x1xf32>
    %187 = vector.extract_strided_slice %183 {offsets = [0, 0], sizes = [1, 256], strides = [1, 1]} : vector<4x256xf32> to vector<1x256xf32>
    %188 = vector.broadcast %186 : vector<8x1xf32> to vector<8x256xf32>
    %189 = vector.broadcast %187 : vector<1x256xf32> to vector<8x256xf32>
    %190 = arith.mulf %188, %189 : vector<8x256xf32>
    %191 = arith.addf %179, %190 : vector<8x256xf32>
    %192 = vector.extract_strided_slice %185 {offsets = [0, 1], sizes = [8, 1], strides = [1, 1]} : vector<8x4xf32> to vector<8x1xf32>
    %193 = vector.extract_strided_slice %183 {offsets = [1, 0], sizes = [1, 256], strides = [1, 1]} : vector<4x256xf32> to vector<1x256xf32>
    %194 = vector.broadcast %192 : vector<8x1xf32> to vector<8x256xf32>
    %195 = vector.broadcast %193 : vector<1x256xf32> to vector<8x256xf32>
    %196 = arith.mulf %194, %195 : vector<8x256xf32>
    %197 = arith.addf %191, %196 : vector<8x256xf32>
    %198 = vector.extract_strided_slice %185 {offsets = [0, 2], sizes = [8, 1], strides = [1, 1]} : vector<8x4xf32> to vector<8x1xf32>
    %199 = vector.extract_strided_slice %183 {offsets = [2, 0], sizes = [1, 256], strides = [1, 1]} : vector<4x256xf32> to vector<1x256xf32>
    %200 = vector.broadcast %198 : vector<8x1xf32> to vector<8x256xf32>
    %201 = vector.broadcast %199 : vector<1x256xf32> to vector<8x256xf32>
    %202 = arith.mulf %200, %201 : vector<8x256xf32>
    %203 = arith.addf %197, %202 : vector<8x256xf32>
    %204 = vector.extract_strided_slice %185 {offsets = [0, 3], sizes = [8, 1], strides = [1, 1]} : vector<8x4xf32> to vector<8x1xf32>
    %205 = vector.extract_strided_slice %183 {offsets = [3, 0], sizes = [1, 256], strides = [1, 1]} : vector<4x256xf32> to vector<1x256xf32>
    %206 = vector.broadcast %204 : vector<8x1xf32> to vector<8x256xf32>
    %207 = vector.broadcast %205 : vector<1x256xf32> to vector<8x256xf32>
    %208 = arith.mulf %206, %207 : vector<8x256xf32>
    %209 = arith.addf %203, %208 : vector<8x256xf32>
    %c240_i32 = arith.constant 240 : i32
    %210 = tpu.dynamic_rotate %1 by %c240_i32 dim 1 : vector<4x256xf32>, i32 -> vector<4x256xf32>
    %211 = vector.extract_strided_slice %2 {offsets = [7, 0], sizes = [1, 256], strides = [1, 1]} : vector<9x256xf32> to vector<1x256xf32>
    %212 = vector.broadcast %211 : vector<1x256xf32> to vector<4x256xf32>
    %213 = arith.mulf %210, %212 : vector<4x256xf32>
    %c7 = arith.constant 7 : index
    %c0_19 = arith.constant 0 : index
    %c0_20 = arith.constant 0 : index
    %214 = vector.load %arg2[%c7, %c0_19, %c0_20] : memref<9x8x4xf32, #tpu.memory_space<vmem>>, vector<1x8x4xf32>
    %215 = vector.shape_cast %214 : vector<1x8x4xf32> to vector<8x4xf32>
    %216 = vector.extract_strided_slice %215 {offsets = [0, 0], sizes = [8, 1], strides = [1, 1]} : vector<8x4xf32> to vector<8x1xf32>
    %217 = vector.extract_strided_slice %213 {offsets = [0, 0], sizes = [1, 256], strides = [1, 1]} : vector<4x256xf32> to vector<1x256xf32>
    %218 = vector.broadcast %216 : vector<8x1xf32> to vector<8x256xf32>
    %219 = vector.broadcast %217 : vector<1x256xf32> to vector<8x256xf32>
    %220 = arith.mulf %218, %219 : vector<8x256xf32>
    %221 = arith.addf %209, %220 : vector<8x256xf32>
    %222 = vector.extract_strided_slice %215 {offsets = [0, 1], sizes = [8, 1], strides = [1, 1]} : vector<8x4xf32> to vector<8x1xf32>
    %223 = vector.extract_strided_slice %213 {offsets = [1, 0], sizes = [1, 256], strides = [1, 1]} : vector<4x256xf32> to vector<1x256xf32>
    %224 = vector.broadcast %222 : vector<8x1xf32> to vector<8x256xf32>
    %225 = vector.broadcast %223 : vector<1x256xf32> to vector<8x256xf32>
    %226 = arith.mulf %224, %225 : vector<8x256xf32>
    %227 = arith.addf %221, %226 : vector<8x256xf32>
    %228 = vector.extract_strided_slice %215 {offsets = [0, 2], sizes = [8, 1], strides = [1, 1]} : vector<8x4xf32> to vector<8x1xf32>
    %229 = vector.extract_strided_slice %213 {offsets = [2, 0], sizes = [1, 256], strides = [1, 1]} : vector<4x256xf32> to vector<1x256xf32>
    %230 = vector.broadcast %228 : vector<8x1xf32> to vector<8x256xf32>
    %231 = vector.broadcast %229 : vector<1x256xf32> to vector<8x256xf32>
    %232 = arith.mulf %230, %231 : vector<8x256xf32>
    %233 = arith.addf %227, %232 : vector<8x256xf32>
    %234 = vector.extract_strided_slice %215 {offsets = [0, 3], sizes = [8, 1], strides = [1, 1]} : vector<8x4xf32> to vector<8x1xf32>
    %235 = vector.extract_strided_slice %213 {offsets = [3, 0], sizes = [1, 256], strides = [1, 1]} : vector<4x256xf32> to vector<1x256xf32>
    %236 = vector.broadcast %234 : vector<8x1xf32> to vector<8x256xf32>
    %237 = vector.broadcast %235 : vector<1x256xf32> to vector<8x256xf32>
    %238 = arith.mulf %236, %237 : vector<8x256xf32>
    %239 = arith.addf %233, %238 : vector<8x256xf32>
    %c239_i32 = arith.constant 239 : i32
    %240 = tpu.dynamic_rotate %1 by %c239_i32 dim 1 : vector<4x256xf32>, i32 -> vector<4x256xf32>
    %241 = vector.extract_strided_slice %2 {offsets = [8, 0], sizes = [1, 256], strides = [1, 1]} : vector<9x256xf32> to vector<1x256xf32>
    %242 = vector.broadcast %241 : vector<1x256xf32> to vector<4x256xf32>
    %243 = arith.mulf %240, %242 : vector<4x256xf32>
    %c8 = arith.constant 8 : index
    %c0_21 = arith.constant 0 : index
    %c0_22 = arith.constant 0 : index
    %244 = vector.load %arg2[%c8, %c0_21, %c0_22] : memref<9x8x4xf32, #tpu.memory_space<vmem>>, vector<1x8x4xf32>
    %245 = vector.shape_cast %244 : vector<1x8x4xf32> to vector<8x4xf32>
    %246 = vector.extract_strided_slice %245 {offsets = [0, 0], sizes = [8, 1], strides = [1, 1]} : vector<8x4xf32> to vector<8x1xf32>
    %247 = vector.extract_strided_slice %243 {offsets = [0, 0], sizes = [1, 256], strides = [1, 1]} : vector<4x256xf32> to vector<1x256xf32>
    %248 = vector.broadcast %246 : vector<8x1xf32> to vector<8x256xf32>
    %249 = vector.broadcast %247 : vector<1x256xf32> to vector<8x256xf32>
    %250 = arith.mulf %248, %249 : vector<8x256xf32>
    %251 = arith.addf %239, %250 : vector<8x256xf32>
    %252 = vector.extract_strided_slice %245 {offsets = [0, 1], sizes = [8, 1], strides = [1, 1]} : vector<8x4xf32> to vector<8x1xf32>
    %253 = vector.extract_strided_slice %243 {offsets = [1, 0], sizes = [1, 256], strides = [1, 1]} : vector<4x256xf32> to vector<1x256xf32>
    %254 = vector.broadcast %252 : vector<8x1xf32> to vector<8x256xf32>
    %255 = vector.broadcast %253 : vector<1x256xf32> to vector<8x256xf32>
    %256 = arith.mulf %254, %255 : vector<8x256xf32>
    %257 = arith.addf %251, %256 : vector<8x256xf32>
    %258 = vector.extract_strided_slice %245 {offsets = [0, 2], sizes = [8, 1], strides = [1, 1]} : vector<8x4xf32> to vector<8x1xf32>
    %259 = vector.extract_strided_slice %243 {offsets = [2, 0], sizes = [1, 256], strides = [1, 1]} : vector<4x256xf32> to vector<1x256xf32>
    %260 = vector.broadcast %258 : vector<8x1xf32> to vector<8x256xf32>
    %261 = vector.broadcast %259 : vector<1x256xf32> to vector<8x256xf32>
    %262 = arith.mulf %260, %261 : vector<8x256xf32>
    %263 = arith.addf %257, %262 : vector<8x256xf32>
    %264 = vector.extract_strided_slice %245 {offsets = [0, 3], sizes = [8, 1], strides = [1, 1]} : vector<8x4xf32> to vector<8x1xf32>
    %265 = vector.extract_strided_slice %243 {offsets = [3, 0], sizes = [1, 256], strides = [1, 1]} : vector<4x256xf32> to vector<1x256xf32>
    %266 = vector.broadcast %264 : vector<8x1xf32> to vector<8x256xf32>
    %267 = vector.broadcast %265 : vector<1x256xf32> to vector<8x256xf32>
    %268 = arith.mulf %266, %267 : vector<8x256xf32>
    %269 = arith.addf %263, %268 : vector<8x256xf32>
    %c0_23 = arith.constant 0 : index
    %c0_24 = arith.constant 0 : index
    %270 = vector.load %arg3[%c0_23, %c0_24] : memref<8x1xf32, #tpu.memory_space<vmem>>, vector<8x1xf32>
    %271 = vector.broadcast %270 : vector<8x1xf32> to vector<8x256xf32>
    %272 = arith.addf %269, %271 : vector<8x256xf32>
    %cst_25 = arith.constant 0.000000e+00 : f32
    %273 = vector.broadcast %cst_25 : f32 to vector<8x256xf32>
    %274 = arith.maximumf %272, %273 : vector<8x256xf32>
    %c0_26 = arith.constant 0 : index
    %c0_27 = arith.constant 0 : index
    %c0_28 = arith.constant 0 : index
    %275 = vector.load %arg6[%c0_26, %c0_27, %c0_28] : memref<1x8x256xf32, #tpu.memory_space<vmem>>, vector<1x8x256xf32>
    %276 = vector.shape_cast %275 : vector<1x8x256xf32> to vector<8x256xf32>
    %277 = vector.shape_cast %274 : vector<8x256xf32> to vector<1x8x256xf32>
    tpu.vector_store %arg6[%c0_26, %c0_27, %c0_28], %277 {strides = array<i32>} : memref<1x8x256xf32, #tpu.memory_space<vmem>>, vector<1x8x256xf32>,
    return
  }
  func.func @transform_0(%arg0: i32, %arg1: i32) -> (i32, i32, i32) {
    %c0_i32 = arith.constant 0 : i32
    %c0_i32_0 = arith.constant 0 : i32
    %c0_i32_1 = arith.constant 0 : i32
    return %c0_i32, %arg1, %c0_i32_0 : i32, i32, i32
  }
  func.func @transform_1(%arg0: i32, %arg1: i32) -> (i32, i32) {
    %c0_i32 = arith.constant 0 : i32
    %c0_i32_0 = arith.constant 0 : i32
    return %arg1, %c0_i32 : i32, i32
  }
  func.func @transform_2(%arg0: i32, %arg1: i32) -> (i32, i32) {
    %c0_i32 = arith.constant 0 : i32
    %c0_i32_0 = arith.constant 0 : i32
    %c0_i32_1 = arith.constant 0 : i32
    return %c0_i32, %c0_i32_0 : i32, i32
  }
  func.func @transform_3(%arg0: i32, %arg1: i32) -> (i32, i32, i32) {
    %c0_i32 = arith.constant 0 : i32
    %c0_i32_0 = arith.constant 0 : i32
    %c0_i32_1 = arith.constant 0 : i32
    return %arg0, %c0_i32, %c0_i32_0 : i32, i32, i32
  }
  func.func @transform_4(%arg0: i32, %arg1: i32) -> (i32, i32, i32) {
    %c0_i32 = arith.constant 0 : i32
    %c0_i32_0 = arith.constant 0 : i32
    return %arg0, %arg1, %c0_i32 : i32, i32, i32
  }
}

</mosaic_0001>

<bundles_post_ra>
// kernel: tpu_custom_call.1
= control target key start
LH: loop header
LB: loop body
LE: loop exit
PB: predicated region body
PF: predicated region fallthrough
CT: control target
= control target key end

     0   :  { %9 = vsyncpa [#allocation3], 0  ;;  %s1774_s0 = inlined_call_operand.vmem [shape: f32[9,8,4], index: 0, kind: input, shape index: {}]   ;;  %s1775_s1 = inlined_call_operand.vmem [shape: f32[8,1], index: 1, kind: input, shape index: {}]   ;;  %s1776_s2 = inlined_call_operand.vmem [shape: f32[9,256], index: 2, kind: input, shape index: {}]   ;;  %s1777_s3 = inlined_call_operand.vmem [shape: f32[2,4,256], index: 3, kind: input, shape index: {}]   ;;  %s1778_s4 = inlined_call_operand.hbm [shape: f32[2,8,256], index: 4, kind: output, shape index: {}]  }
   0x1   :  { %11 = vsyncpa [#allocation3 + $0x1], 0  ;;  %s1406_s15 = smov 0   ;;  %s1408_s16 = smov 0  }
   0x2   :  { %s1410_s17 = smov 0   ;;  %s1412_s18 = smov 0  }
   0x3   :  { %s1414_s19 = smov 0   ;;  %s1416_s20 = smov 0  }
   0x4 LB: > { %s1161_s21 = sadd.s32 4294967295, %s1366_s20   ;;  %s1162_s22 = sadd.s32 4294967294, %s1366_s20   ;;  %s1366_s20 = sphi %s1416_s20, %s17_s20   ;;  %s1362_s19 = sphi %s1414_s19, %s1785_s19   ;;  %s1358_s18 = sphi %s1412_s18, %s1784_s18   ;;  %s1354_s17 = sphi %s1410_s17, %s1783_s17   ;;  %s1350_s16 = sphi %s1408_s16, %s1782_s16   ;;  %s1346_s15 = sphi %s1406_s15, %s1781_s15  }
   0x5   : > { %s29_s23 = sadd.s32 1, %s1362_s19  ;;  %s137_s24 = sadd.s32 1, %s1354_s17 }
   0x6   : > { %p31_p0 = scmp.ge.s32.totalorder %s29_s23, 2  ;;  %p147_p1 = scmp.ne.s32.totalorder %s1354_s17, %s1350_s16 }
   0x7   : > { %p148_p2 = scmp.eq.s32.totalorder %s1161_s21, 1  ;;  %p153_p3 = scmp.ne.s32.totalorder %s1350_s16, %s1346_s15 }
   0x8   : > { %s1787_s23 = smov (%p31_p0, %s29_s23), 0  ;;  %p154_p5 = scmp.eq.s32.totalorder %s1162_s22, 1 }
   0x9   : > { %p1446_p4 = por %p148_p2, %p147_p1  ;;  %s132_s26 = ssub.s32 %s1362_s19, %s1787_s23 }
   0xa   : > { %p1167_p6 = scmp.ge.s32.totalorder %s1366_s20, 1  ;;  %p135_p7 = scmp.eq.s32.totalorder %s132_s26, 0 }
   0xb   : > { %p1453_p8 = por %p154_p5, %p153_p3  ;;  %p197_p9 = scmp.lt.s32.totalorder %s1366_s20, 3 }
   0xc   : > { %s1459_s28 = scalar_select %p135_p7, %s1354_s17, %s137_s24  }
   0xd   : > { %p198_p10 = pnand %p1167_p6, %p197_p9 }
   0xe   : > { %v271_v0 = vld [vmem:[%s1774_s0] sm:$0xff] (!%p198_p10)  ;;  %p239_p11 = scmp.lt.s32.totalorder (!%p198_p10), %s1358_s18, 1  ;;  %v1368_v1 = vmov (!%p198_p10), 0   ;;  %v1369_v2 = vmov (!%p198_p10), 2   ;;  %v1370_v3 = vmov (!%p198_p10), 1   ;;  %s1371_s10 = smov (!%p198_p10), 17   ;;  %v256_v19 = vlaneseq (!%p198_p10) }
   0xf   : > { %201 = sbr.rel (%p198_p10) target bundleno = 310 (0x136), region = 36  ;;  %1255 = vset.pattern.permute.xlu1 (!%p198_p10), %v1368_v1  ;;  %1257 = vset.pattern.permute.xlu0 (!%p198_p10), %v1369_v2  ;;  %v1372_v6 = vmov (!%p198_p10), 3   ;;  %s1373_s11 = smov (!%p198_p10), 16   ;;  %v1171_v7 = vld [vmem:[%s1774_s0 + $0x8] sm:$0xff] (!%p198_p10)  ;;  %v1172_v8 = vld [vmem:[%s1774_s0 + $0x10] sm:$0xff] (!%p198_p10)  ;;  %v1173_v9 = vld [vmem:[%s1774_s0 + $0x18] sm:$0xff] (!%p198_p10) }
  0x10   : > { %274 = vperm.xlu1 (!%p198_p10), %1255, %v271_v0   ;;  %s1374_s14 = smov (!%p198_p10), 15   ;;  %s1375_s24 = smov (!%p198_p10), 1   ;;  %v1175_v10 = vld [vmem:[%s1774_s0 + $0x28] sm:$0xff] (!%p198_p10)  ;;  %v1176_v11 = vld [vmem:[%s1774_s0 + $0x30] sm:$0xff] (!%p198_p10)  ;;  %v1174_v12 = vld [vmem:[%s1774_s0 + $0x20] sm:$0xff] (!%p198_p10)  ;;  %v1549_v21 = vshrl.u32 (!%p198_p10), %v256_v19, 7 }
  0x11   : > { %v1177_v13 = vld [vmem:[%s1774_s0 + $0x38] sm:$0xff] (!%p198_p10)  ;;  %v1180_v14 = vld [vmem:[%s1774_s0 + $0x40] sm:$0xff] (!%p198_p10)  ;;  %s1378_s26 = smov (!%p198_p10), 112   ;;  %s1379_s29 = smov (!%p198_p10), 111   ;;  %v1551_v22 = vand.u32 (!%p198_p10), 127, %v256_v19  ;;  %v1565_v27 = vld [vmem:[%s1776_s2 + $0x8] sm:$0xff] (!%p198_p10) }
  0x12   : > { %v1032_v15 = vld [vmem:[%s1775_s1] sm:$0xff] (!%p198_p10)  ;;  %v1555_v25 = vsub.s32 (!%p198_p10), 0, %v1549_v21  ;;  %v1573_v34 = vsub.s32 (!%p198_p10), 1, %v1549_v21  ;;  %v1576_v37 = vsub.s32 (!%p198_p10), 2, %v1549_v21  ;;  %v1590_v50 = vsub.s32 (!%p198_p10), 3, %v1549_v21  ;;  %s228_s12 = sand.u32 (!%p198_p10), 1, %s1350_s16  }
  0x13   : > { %v1560_v26 = vld [vmem:[%s1776_s2] sm:$0xff] (!%p198_p10)  ;;  %vm258_vm0 = vcmp.lt.s32.totalorder (!%p198_p10), %v1551_v22, 17  ;;  %vm341_vm1 = vcmp.lt.s32.totalorder (!%p198_p10), %v1551_v22, 16  ;;  %vm425_vm2 = vcmp.lt.s32.totalorder (!%p198_p10), %v1551_v22, 15  ;;  %vm509_vm3 = vcmp.lt.s32.totalorder (!%p198_p10), %v1551_v22, 1  ;;  %s1168_s13 = sshll.u32 (!%p198_p10), %s228_s12, 4 }
  0x14   : > { %1256 = vset.pattern.permute.xlu1 (!%p198_p10), %v1370_v3  ;;  %v264_v30 = vrot.slane (!%p198_p10), %v1560_v26, %v1555_v25  ;;  %v268_v31 = vrot.slane (!%p198_p10), %v1565_v27, %v1555_v25  ;;  %v347_v42 = vrot.slane (!%p198_p10), %v1560_v26, %v1573_v34  ;;  %v351_v43 = vrot.slane (!%p198_p10), %v1565_v27, %v1573_v34  ;;  %s230_s21 = scalar_lea.vmem (!%p198_p10), [#allocation2], %s1168_s13 }
  0x15   : > { %290 = vperm.xlu1 (!%p198_p10), %1256, %v271_v0   ;;  %vm700_vm4 = vcmp.lt.s32.totalorder (!%p198_p10), %v1551_v22, 127  ;;  %vm784_vm5 = vcmp.lt.s32.totalorder (!%p198_p10), %v1551_v22, 113  ;;  %vm868_vm6 = vcmp.lt.s32.totalorder (!%p198_p10), %v1551_v22, 112  ;;  %vm952_vm7 = vcmp.lt.s32.totalorder (!%p198_p10), %v1551_v22, 111  ;;  %s1061_s22 = sshll.u32 (!%p198_p10), %s230_s21, 4  ;;  %s1727_s22 = int_to_ptr.vmem [resolvable:$true] %s1061_s22 }
  0x16   : > { %s240_s5 = scalar_select %p239_p11, %s1358_s18, 1 }
  0x17   : > { %s1288_s30 = scalar_lea.vmem %s1727_s22, 256 }
  0x18   : > { %s1186_s6 = sshll.u32 %s240_s5, 3  ;;  %p1289_p12 = scmp.ne.s32.totalorder %s1727_s22, %s1288_s30 }
  0x19   : > { %s243_s9 = scalar_lea.vmem %s1777_s3, %s1186_s6  ;;  %1258 = vset.pattern.permute.xlu1 %v1372_v6  ;;  %s1380_s5 = smov [#allocation2]  }
  0x1a   : > { %v1472_v4 = vld [vmem:[%s243_s9] sm:$0xff]  ;;  %322 = vperm.xlu1 %1258, %v271_v0   ;;  %p1290_p13 = pnand %p1289_p12, %p1446_p4  ;;  %s1292_s6 = sshll.u32 %s1380_s5, 4  ;;  %s1293_s6 = int_to_ptr.vmem [resolvable:$false] %s1292_s6 }
  0x1b   : > { %252 = vrot.lane.b32.xlu0 %v1472_v4, %s1371_s10  ;;  %v1477_v5 = vcombine.high %v1472_v4, %v1472_v4  ;;  %s1294_s7 = scalar_lea.vmem %s1293_s6, 512  ;;  %p1295_p1 = scmp.lt.s32.totalorder %s1727_s22, %s1293_s6 }
  0x1c   : > { %p1291_p0 = pneg %p1290_p13  ;;  %p1296_p2 = scmp.lt.s32.totalorder %s1294_s7, %s1288_s30 }
  0x1e   : > { %337 = vrot.lane.b32.xlu1 %v1472_v4, %s1373_s11  ;;  %p1297_p3 = por %p1296_p2, %p1295_p1 }
  0x1f   : > { %254 = vrot.lane.b32.xlu0 %v1477_v5, %s1371_s10  ;;  %1259 = vset.pattern.permute.xlu1 %v1368_v1 }
  0x20   : > { %p1298_p5 = pnand %p1297_p3, %p1291_p0 }
  0x22   : > { %358 = vperm.xlu1 %1259, %v1171_v7  }
  0x23   : > { %306 = vperm.xlu0 %1257, %v271_v0  }
  0x26   : > { %1261 = vset.pattern.permute.xlu1 %v1369_v2 }
  0x27   : > { %339 = vrot.lane.b32.xlu0 %v1477_v5, %s1373_s11  ;;  %390 = vperm.xlu1 %1261, %v1171_v7  }
  0x28   : > { %1260 = vset.pattern.permute.xlu0 %v1370_v3 }
  0x2b   : > { %374 = vperm.xlu0 %1260, %v1171_v7   ;;  %1262 = vset.pattern.permute.xlu1 %v1372_v6 }
  0x2c   : > { %406 = vperm.xlu1 %1262, %v1171_v7  }
  0x2f   : > { %421 = vrot.lane.b32.xlu0 %v1472_v4, %s1374_s14 }
  0x30   : > { %1263 = vset.pattern.permute.xlu0 %v1368_v1  ;;  %423 = vrot.lane.b32.xlu1 %v1477_v5, %s1374_s14  ;;  %s1376_s14 = smov 127  }
  0x31   : > { %1264 = vset.pattern.permute.xlu1 %v1370_v3 }
  0x33   : > { %442 = vperm.xlu0 %1263, %v1172_v8  }
  0x34   : > { %458 = vperm.xlu1 %1264, %v1172_v8  }
  0x37   : > { %1266 = vset.pattern.permute.xlu0 %v1372_v6 }
  0x38   : > { %490 = vperm.xlu0 %1266, %v1172_v8   ;;  %1265 = vset.pattern.permute.xlu1 %v1369_v2 }
  0x39   : > { %474 = vperm.xlu1 %1265, %v1172_v8  }
  0x3c   : > { %507 = vrot.lane.b32.xlu0 %v1477_v5, %s1375_s24 }
  0x3d   : > { %1269 = vset.pattern.permute.xlu0 %v1369_v2  ;;  %1267 = vset.pattern.permute.xlu1 %v1368_v1 }
  0x3e   : > { %526 = vperm.xlu1 %1267, %v1173_v9  }
  0x40   : > { %558 = vperm.xlu0 %1269, %v1173_v9  }
  0x42   : > { %505 = vrot.lane.b32.xlu1 %v1472_v4, %s1375_s24  ;;  %s1377_s24 = smov 113  }
  0x43   : > { %1268 = vset.pattern.permute.xlu1 %v1370_v3 }
  0x44   : > { %1274 = vset.pattern.permute.xlu0 %v1368_v1 }
  0x45   : > { %717 = vperm.xlu0 %1274, %v1175_v10  }
  0x46   : > { %542 = vperm.xlu1 %1268, %v1173_v9  }
  0x49   : > { %801 = vperm.xlu0 %1274, %v1176_v11  }
  0x4a   : > { %1270 = vset.pattern.permute.xlu1 %v1372_v6 }
  0x4b   : > { %574 = vperm.xlu1 %1270, %v1173_v9  }
  0x4d   : > { %1277 = vset.pattern.permute.xlu0 %v1370_v3 }
  0x4e   : > { %619 = vperm.xlu0 %1277, %v1174_v12  }
  0x4f   : > { %1271 = vset.pattern.permute.xlu1 %v1368_v1 }
  0x50   : > { %593 = vperm.xlu1 %1271, %v1174_v12  }
  0x52   : > { %733 = vperm.xlu0 %1277, %v1175_v10  }
  0x54   : > { %1272 = vset.pattern.permute.xlu1 %v1369_v2 }
  0x55   : > { %645 = vperm.xlu1 %1272, %v1174_v12  }
  0x56   : > { %817 = vperm.xlu0 %1277, %v1176_v11  }
  0x59   : > { %1273 = vset.pattern.permute.xlu1 %v1372_v6 }
  0x5a   : > { %901 = vperm.xlu0 %1277, %v1177_v13   ;;  %671 = vperm.xlu1 %1273, %v1174_v12  }
  0x5e   : > { %1280 = vset.pattern.permute.xlu0 %v1368_v1  ;;  %696 = vrot.lane.b32.xlu1 %v1472_v4, %s1376_s14 }
  0x5f   : > { %885 = vperm.xlu0 %1280, %v1177_v13   ;;  %1275 = vset.pattern.permute.xlu1 %v1369_v2 }
  0x62   : > { %698 = vrot.lane.b32.xlu1 %v1477_v5, %s1376_s14  ;;  %s1187_s14 = sshll.u32 %s1358_s18, 8  ;;  %s1045_s18 = scalar_lea.sflag [#allocation3], %s228_s12 }
  0x63   : > { %969 = vperm.xlu0 %1280, %v1180_v14  }
  0x66   : > { %749 = vperm.xlu1 %1275, %v1175_v10  }
  0x67   : > { %1283 = vset.pattern.permute.xlu0 %v1370_v3 }
  0x68   : > { %985 = vperm.xlu0 %1283, %v1180_v14  }
  0x6a   : > { %1276 = vset.pattern.permute.xlu1 %v1372_v6 }
  0x6b   : > { %765 = vperm.xlu1 %1276, %v1175_v10  }
  0x6c   : > { %1286 = vset.pattern.permute.xlu0 %v1368_v1 }
  0x6d   : > { %1035 = vperm.xlu0 %1286, %v1032_v15  }
  0x6f   : > { %780 = vrot.lane.b32.xlu1 %v1472_v4, %s1377_s24 }
  0x70   : > { %1278 = vset.pattern.permute.xlu1 %v1369_v2 }
  0x73   : > { %782 = vrot.lane.b32.xlu1 %v1477_v5, %s1377_s24 }
  0x77   : > { %833 = vperm.xlu1 %1278, %v1176_v11  }
  0x7b   : > { %1279 = vset.pattern.permute.xlu1 %v1372_v6 }
  0x7c   : > { %849 = vperm.xlu1 %1279, %v1176_v11  }
  0x80   : > { %864 = vrot.lane.b32.xlu1 %v1472_v4, %s1378_s26 }
  0x81   : > { %1281 = vset.pattern.permute.xlu1 %v1369_v2 }
  0x84   : > { %866 = vrot.lane.b32.xlu1 %v1477_v5, %s1378_s26 }
  0x88   : > { %917 = vperm.xlu1 %1281, %v1177_v13  }
  0x8c   : > { %1282 = vset.pattern.permute.xlu1 %v1372_v6 }
  0x8d   : > { %933 = vperm.xlu1 %1282, %v1177_v13   ;;  %v253_v18 = vpop.permute.xlu0 %252  ;;  %v431_v13 = vrot.slane %v1560_v26, %v1576_v37 }
  0x8f   : > { %v275_v16 = vpop.permute.xlu1 %274 }
  0x91   : > { %948 = vrot.lane.b32.xlu1 %v1472_v4, %s1379_s29  ;;  %v255_v23 = vpop.permute.xlu0 %254 }
  0x92   : > { %1284 = vset.pattern.permute.xlu1 %v1369_v2  ;;  %v259_v32 = vsel %vm258_vm0, %v253_v18, %v255_v23  ;;  %v260_v33 = vsel %vm258_vm0, %v255_v23, %v253_v18 }
  0x93   : > { %v269_v35 = vmul.f32 %v264_v30, %v260_v33  ;;  %v270_v36 = vmul.f32 %v268_v31, %v259_v32 }
  0x94   : > { %v291_v17 = vpop.permute.xlu1 %290 }
  0x95   : > { %950 = vrot.lane.b32.xlu1 %v1477_v5, %s1379_s29  ;;  %v296_v40 = vrot.slane %v269_v35, %v1573_v34  ;;  %v300_v41 = vrot.slane %v270_v36, %v1573_v34  ;;  %v280_v46 = vrot.slane %v269_v35, %v1555_v25  ;;  %v284_v47 = vrot.slane %v270_v36, %v1555_v25  ;;  %s1725_s29 = scalar_lea.hbm %s1778_s4, %s1187_s14 }
  0x96   : > { %v312_v48 = vrot.slane %v269_v35, %v1576_v37  ;;  %v316_v49 = vrot.slane %v270_v36, %v1576_v37  ;;  %v328_v61 = vrot.slane %v269_v35, %v1590_v50  ;;  %v332_v62 = vrot.slane %v270_v36, %v1590_v50 }
  0x97   : > { %v301_v52 = vmul.f32 %v296_v40, %v291_v17  ;;  %v302_v53 = vmul.f32 %v300_v41, %v291_v17  ;;  %v285_v56 = vmul.f32 %v280_v46, %v275_v16  ;;  %v286_v57 = vmul.f32 %v284_v47, %v275_v16 }
  0x99   : > { %v323_v20 = vpop.permute.xlu1 %322  ;;  %1001 = vperm.xlu1 %1284, %v1180_v14   ;;  %v303_v0 = vadd.f32 %v301_v52, %v285_v56  ;;  %v304_v1 = vadd.f32 %v302_v53, %v286_v57 }
  0x9a   : > { %v333_v9 = vmul.f32 %v328_v61, %v323_v20  ;;  %v334_v10 = vmul.f32 %v332_v62, %v323_v20 }
  0x9d   : > { %v338_v24 = vpop.permute.xlu1 %337  ;;  %1285 = vset.pattern.permute.xlu1 %v1372_v6 }
  0x9e   : > { %1017 = vperm.xlu1 %1285, %v1180_v14   ;;  %v435_v14 = vrot.slane %v1565_v27, %v1576_v37 }
  0xa1   : > { %v359_v29 = vpop.permute.xlu1 %358 }
  0xa2   : > { %v307_v28 = vpop.permute.xlu0 %306 }
  0xa3   : > { %v317_v58 = vmul.f32 %v312_v48, %v307_v28  ;;  %v318_v59 = vmul.f32 %v316_v49, %v307_v28 }
  0xa5   : > { %v319_v5 = vadd.f32 %v317_v58, %v303_v0  ;;  %v320_v6 = vadd.f32 %v318_v59, %v304_v1 }
  0xa6   : > { %v340_v38 = vpop.permute.xlu0 %339  ;;  %v391_v39 = vpop.permute.xlu1 %390 }
  0xa7   : > { %v342_v44 = vsel %vm341_vm1, %v338_v24, %v340_v38  ;;  %v343_v45 = vsel %vm341_vm1, %v340_v38, %v338_v24  ;;  %v335_v15 = vadd.f32 %v333_v9, %v319_v5  ;;  %v336_v16 = vadd.f32 %v334_v10, %v320_v6 }
  0xa8   : > { %v352_v54 = vmul.f32 %v347_v42, %v343_v45  ;;  %v353_v55 = vmul.f32 %v351_v43, %v342_v44 }
  0xaa   : > { %v375_v60 = vpop.permute.xlu0 %374  ;;  %v364_v2 = vrot.slane %v352_v54, %v1555_v25  ;;  %v368_v3 = vrot.slane %v353_v55, %v1555_v25  ;;  %v380_v17 = vrot.slane %v352_v54, %v1573_v34  ;;  %v384_v18 = vrot.slane %v353_v55, %v1573_v34 }
  0xab   : > { %v407_v51 = vpop.permute.xlu1 %406  ;;  %v400_v31 = vrot.slane %v353_v55, %v1576_v37  ;;  %v412_v41 = vrot.slane %v352_v54, %v1590_v50  ;;  %v416_v42 = vrot.slane %v353_v55, %v1590_v50  ;;  %v515_v55 = vrot.slane %v1560_v26, %v1590_v50 }
  0xac   : > { %v369_v11 = vmul.f32 %v364_v2, %v359_v29  ;;  %v370_v12 = vmul.f32 %v368_v3, %v359_v29  ;;  %v396_v29 = vrot.slane %v352_v54, %v1576_v37  ;;  %v385_v32 = vmul.f32 %v380_v17, %v375_v60 }
  0xad   : > { %v386_v33 = vmul.f32 %v384_v18, %v375_v60  ;;  %v402_v45 = vmul.f32 %v400_v31, %v391_v39  ;;  %v417_v53 = vmul.f32 %v412_v41, %v407_v51  ;;  %v418_v56 = vmul.f32 %v416_v42, %v407_v51 }
  0xae   : > { %v422_v7 = vpop.permute.xlu0 %421  ;;  %v371_v24 = vadd.f32 %v369_v11, %v335_v15  ;;  %v372_v28 = vadd.f32 %v370_v12, %v336_v16  ;;  %v401_v44 = vmul.f32 %v396_v29, %v391_v39  ;;  %v519_v39 = vrot.slane %v1565_v27, %v1590_v50 }
  0xaf   : > { %v424_v63 = vpop.permute.xlu1 %423 }
  0xb0   : > { %v426_v19 = vsel %vm425_vm2, %v422_v7, %v424_v63  ;;  %v427_v23 = vsel %vm425_vm2, %v424_v63, %v422_v7  ;;  %v387_v38 = vadd.f32 %v385_v32, %v371_v24  ;;  %v388_v40 = vadd.f32 %v386_v33, %v372_v28 }
  0xb1   : > { %v436_v35 = vmul.f32 %v431_v13, %v427_v23  ;;  %v437_v36 = vmul.f32 %v435_v14, %v426_v19 }
  0xb2   : > { %v443_v30 = vpop.permute.xlu0 %442  ;;  %v403_v49 = vadd.f32 %v401_v44, %v387_v38  ;;  %v404_v52 = vadd.f32 %v402_v45, %v388_v40 }
  0xb3   : > { %v459_v8 = vpop.permute.xlu1 %458  ;;  %v448_v46 = vrot.slane %v436_v35, %v1555_v25  ;;  %v452_v47 = vrot.slane %v437_v36, %v1555_v25  ;;  %v464_v62 = vrot.slane %v436_v35, %v1573_v34  ;;  %v468_v63 = vrot.slane %v437_v36, %v1573_v34 }
  0xb4   : > { %v419_v60 = vadd.f32 %v417_v53, %v403_v49  ;;  %v420_v61 = vadd.f32 %v418_v56, %v404_v52  ;;  %v480_v5 = vrot.slane %v436_v35, %v1576_v37  ;;  %v484_v6 = vrot.slane %v437_v36, %v1576_v37 }
  0xb5   : > { %v453_v58 = vmul.f32 %v448_v46, %v443_v30  ;;  %v454_v59 = vmul.f32 %v452_v47, %v443_v30  ;;  %v469_v7 = vmul.f32 %v464_v62, %v459_v8  ;;  %v470_v9 = vmul.f32 %v468_v63, %v459_v8 }
  0xb6   : > { %v496_v17 = vrot.slane %v436_v35, %v1590_v50  ;;  %v500_v18 = vrot.slane %v437_v36, %v1590_v50  ;;  %v602_v36 = vsub.s32 4, %v1549_v21  ;;  %v628_v53 = vsub.s32 5, %v1549_v21 }
  0xb7   : > { %v491_v48 = vpop.permute.xlu0 %490  ;;  %v455_v2 = vadd.f32 %v453_v58, %v419_v60  ;;  %v456_v3 = vadd.f32 %v454_v59, %v420_v61  ;;  %v625_v61 = vrot.slane %v1472_v4, %v1573_v34 }
  0xb8   : > { %v475_v20 = vpop.permute.xlu1 %474  ;;  %v501_v8 = vmul.f32 %v496_v17, %v491_v48  ;;  %v502_v31 = vmul.f32 %v500_v18, %v491_v48  ;;  %v603_v52 = vrot.slane %v1472_v4, %v602_v36  ;;  %v629_v62 = vrot.slane %v1472_v4, %v628_v53 }
  0xb9   : > { %v471_v12 = vadd.f32 %v469_v7, %v455_v2  ;;  %v472_v13 = vadd.f32 %v470_v9, %v456_v3  ;;  %v485_v14 = vmul.f32 %v480_v5, %v475_v20  ;;  %v486_v15 = vmul.f32 %v484_v6, %v475_v20 }
  0xba   : > { %v613_v60 = vrot.slane %v603_v52, %v1555_v25  ;;  %v1643_v2 = vsub.s32 6, %v1549_v21  ;;  %v635_v7 = vrot.slane %v625_v61, %v1573_v34  ;;  %v639_v9 = vrot.slane %v629_v62, %v1573_v34 }
  0xbb   : > { %v508_v54 = vpop.permute.xlu0 %507  ;;  %v487_v24 = vadd.f32 %v485_v14, %v471_v12  ;;  %v488_v28 = vadd.f32 %v486_v15, %v472_v13  ;;  %v1648_v12 = vsub.s32 7, %v1549_v21  ;;  %v651_v17 = vrot.slane %v1472_v4, %v1576_v37 }
  0xbc   : > { %v706_v18 = vrot.slane %v1560_v26, %v628_v53 }
  0xbd   : > { %v527_v43 = vpop.permute.xlu1 %526  ;;  %v503_v38 = vadd.f32 %v501_v8, %v487_v24  ;;  %v504_v40 = vadd.f32 %v502_v31, %v488_v28  ;;  %v677_v28 = vrot.slane %v1472_v4, %v1590_v50 }
  0xbf   : > { %v559_v30 = vpop.permute.xlu0 %558  ;;  %v687_v36 = vrot.slane %v677_v28, %v1590_v50 }
  0xc1   : > { %v506_v57 = vpop.permute.xlu1 %505 }
  0xc2   : > { %v510_v0 = vsel %vm509_vm3, %v506_v57, %v508_v54  ;;  %v511_v51 = vsel %vm509_vm3, %v508_v54, %v506_v57 }
  0xc3   : > { %v520_v10 = vmul.f32 %v515_v55, %v511_v51  ;;  %v521_v11 = vmul.f32 %v519_v39, %v510_v0 }
  0xc4   : > { %v1625_v45 = vpop.permute.xlu0 %717 }
  0xc5   : > { %v543_v1 = vpop.permute.xlu1 %542  ;;  %v532_v19 = vrot.slane %v520_v10, %v1555_v25  ;;  %v536_v23 = vrot.slane %v521_v11, %v1555_v25  ;;  %v548_v20 = vrot.slane %v520_v10, %v1573_v34  ;;  %v552_v35 = vrot.slane %v521_v11, %v1573_v34 }
  0xc6   : > { %v564_v49 = vrot.slane %v520_v10, %v1576_v37  ;;  %v568_v48 = vrot.slane %v521_v11, %v1576_v37  ;;  %v580_v51 = vrot.slane %v520_v10, %v1590_v50 }
  0xc7   : > { %v537_v32 = vmul.f32 %v532_v19, %v527_v43  ;;  %v538_v33 = vmul.f32 %v536_v23, %v527_v43  ;;  %v553_v46 = vmul.f32 %v548_v20, %v543_v1  ;;  %v554_v47 = vmul.f32 %v552_v35, %v543_v1 }
  0xc8   : > { %v599_v43 = vrot.slane %v1472_v4, %v1555_v25  ;;  %v569_v59 = vmul.f32 %v564_v49, %v559_v30  ;;  %v570_v54 = vmul.f32 %v568_v48, %v559_v30  ;;  %v1633_v55 = vpop.permute.xlu0 %801  ;;  %v584_v1 = vrot.slane %v521_v11, %v1590_v50 }
  0xc9   : > { %v539_v41 = vadd.f32 %v537_v32, %v503_v38  ;;  %v540_v42 = vadd.f32 %v538_v33, %v504_v40  ;;  %v710_v19 = vrot.slane %v1565_v27, %v628_v53  ;;  %v681_v30 = vrot.slane %v1472_v4, %v1648_v12 }
  0xca   : > { %v575_v16 = vpop.permute.xlu1 %574  ;;  %v609_v39 = vrot.slane %v599_v43, %v1555_v25  ;;  %v661_v33 = vrot.slane %v651_v17, %v1576_v37 }
  0xcb   : > { %v555_v56 = vadd.f32 %v553_v46, %v539_v41  ;;  %v556_v57 = vadd.f32 %v554_v47, %v540_v42  ;;  %v585_v5 = vmul.f32 %v580_v51, %v575_v16  ;;  %v586_v6 = vmul.f32 %v584_v1, %v575_v16 }
  0xcc   : > { %v655_v16 = vrot.slane %v1472_v4, %v1643_v2  ;;  %v691_v41 = vrot.slane %v681_v30, %v1590_v50 }
  0xcd   : > { %v571_v63 = vadd.f32 %v569_v59, %v555_v56  ;;  %v572_v0 = vadd.f32 %v570_v54, %v556_v57  ;;  %v620_v11 = vpop.permute.xlu0 %619 }
  0xce   : > { %v640_v31 = vmul.f32 %v635_v7, %v620_v11  ;;  %v641_v32 = vmul.f32 %v639_v9, %v620_v11  ;;  %v665_v38 = vrot.slane %v655_v16, %v1576_v37 }
  0xcf   : > { %v594_v29 = vpop.permute.xlu1 %593  ;;  %v587_v13 = vadd.f32 %v585_v5, %v571_v63  ;;  %v588_v14 = vadd.f32 %v586_v6, %v572_v0  ;;  %v790_v0 = vrot.slane %v1560_v26, %v1643_v2 }
  0xd0   : > { %v614_v10 = vmul.f32 %v609_v39, %v594_v29  ;;  %v615_v15 = vmul.f32 %v613_v60, %v594_v29 }
  0xd1   : > { %v734_v63 = vpop.permute.xlu0 %733 }
  0xd2   : > { %v616_v29 = vadd.f32 %v614_v10, %v587_v13  ;;  %v617_v8 = vadd.f32 %v615_v15, %v588_v14 }
  0xd4   : > { %v646_v44 = vpop.permute.xlu1 %645  ;;  %v642_v42 = vadd.f32 %v640_v31, %v616_v29  ;;  %v643_v46 = vadd.f32 %v641_v32, %v617_v8 }
  0xd5   : > { %v666_v47 = vmul.f32 %v661_v33, %v646_v44  ;;  %v667_v49 = vmul.f32 %v665_v38, %v646_v44  ;;  %v818_v33 = vpop.permute.xlu0 %817 }
  0xd7   : > { %v668_v56 = vadd.f32 %v666_v47, %v642_v42  ;;  %v669_v57 = vadd.f32 %v667_v49, %v643_v46  ;;  %v878_v47 = vrot.slane %v1565_v27, %v1648_v12 }
  0xd9   : > { %v672_v58 = vpop.permute.xlu1 %671 }
  0xda   : > { %v692_v52 = vmul.f32 %v687_v36, %v672_v58  ;;  %v693_v53 = vmul.f32 %v691_v41, %v672_v58  ;;  %v794_v58 = vrot.slane %v1565_v27, %v1643_v2 }
  0xdc   : > { %v694_v60 = vadd.f32 %v692_v52, %v668_v56  ;;  %v695_v61 = vadd.f32 %v693_v53, %v669_v57 }
  0xdd   : > { %v697_v3 = vpop.permute.xlu1 %696 }
  0xe1   : > { %v699_v23 = vpop.permute.xlu1 %698 }
  0xe2   : > { %v701_v21 = vsel %vm700_vm4, %v697_v3, %v699_v23  ;;  %v702_v24 = vsel %vm700_vm4, %v699_v23, %v697_v3 }
  0xe3   : > { %v711_v40 = vmul.f32 %v706_v18, %v701_v21  ;;  %v712_v20 = vmul.f32 %v710_v19, %v702_v24 }
  0xe5   : > { %v750_v35 = vpop.permute.xlu1 %749  ;;  %v723_v4 = vrot.slane %v711_v40, %v1555_v25  ;;  %v727_v48 = vrot.slane %v712_v20, %v1555_v25  ;;  %v739_v62 = vrot.slane %v711_v40, %v1573_v34  ;;  %v743_v44 = vrot.slane %v712_v20, %v1573_v34 }
  0xe6   : > { %v759_v3 = vrot.slane %v712_v20, %v1576_v37  ;;  %v771_v23 = vrot.slane %v711_v40, %v1590_v50  ;;  %v775_v21 = vrot.slane %v712_v20, %v1590_v50  ;;  %v874_v20 = vrot.slane %v1560_v26, %v1648_v12 }
  0xe7   : > { %v728_v59 = vmul.f32 %v723_v4, %v1625_v45  ;;  %v729_v54 = vmul.f32 %v727_v48, %v1625_v45  ;;  %v755_v45 = vrot.slane %v711_v40, %v1576_v37  ;;  %v744_v6 = vmul.f32 %v739_v62, %v734_v63 }
  0xe8   : > { %v745_v7 = vmul.f32 %v743_v44, %v734_v63  ;;  %v761_v18 = vmul.f32 %v759_v3, %v750_v35 }
  0xe9   : > { %v730_v51 = vadd.f32 %v728_v59, %v694_v60  ;;  %v731_v1 = vadd.f32 %v729_v54, %v695_v61  ;;  %v760_v16 = vmul.f32 %v755_v45, %v750_v35 }
  0xea   : > { %v766_v43 = vpop.permute.xlu1 %765 }
  0xeb   : > { %v746_v15 = vadd.f32 %v744_v6, %v730_v51  ;;  %v747_v11 = vadd.f32 %v745_v7, %v731_v1  ;;  %v776_v30 = vmul.f32 %v771_v23, %v766_v43  ;;  %v777_v29 = vmul.f32 %v775_v21, %v766_v43  ;;  %v902_v43 = vpop.permute.xlu0 %901 }
  0xed   : > { %v762_v24 = vadd.f32 %v760_v16, %v746_v15  ;;  %v763_v28 = vadd.f32 %v761_v18, %v747_v11 }
  0xee   : > { %v781_v39 = vpop.permute.xlu1 %780 }
  0xef   : > { %v778_v38 = vadd.f32 %v776_v30, %v762_v24  ;;  %v779_v35 = vadd.f32 %v777_v29, %v763_v28  ;;  %v886_v12 = vpop.permute.xlu0 %885  ;;  %v1178_v24 = vld [vmem:[%s1776_s2 + $0x10] ss:$0 sm:$0xff]  ;;  %v1179_v28 = vld [vmem:[%s1776_s2 + $0x18] ss:$0 sm:$0xff] }
  0xf2   : > { %v783_v5 = vpop.permute.xlu1 %782 }
  0xf3   : > { %v785_v9 = vsel %vm784_vm5, %v781_v39, %v783_v5  ;;  %v786_v13 = vsel %vm784_vm5, %v783_v5, %v781_v39 }
  0xf4   : > { %v795_v14 = vmul.f32 %v790_v0, %v785_v9  ;;  %v796_v10 = vmul.f32 %v794_v58, %v786_v13 }
  0xf6   : > { %v834_v17 = vpop.permute.xlu1 %833  ;;  %v807_v2 = vrot.slane %v795_v14, %v1555_v25  ;;  %v811_v19 = vrot.slane %v796_v10, %v1555_v25  ;;  %v823_v36 = vrot.slane %v795_v14, %v1573_v34  ;;  %v827_v41 = vrot.slane %v796_v10, %v1573_v34 }
  0xf7   : > { %v843_v49 = vrot.slane %v796_v10, %v1576_v37  ;;  %v855_v26 = vrot.slane %v795_v14, %v1590_v50  ;;  %v859_v27 = vrot.slane %v796_v10, %v1590_v50 }
  0xf8   : > { %v812_v8 = vmul.f32 %v807_v2, %v1633_v55  ;;  %v813_v31 = vmul.f32 %v811_v19, %v1633_v55  ;;  %v839_v55 = vrot.slane %v795_v14, %v1576_v37  ;;  %v828_v4 = vmul.f32 %v823_v36, %v818_v33 }
  0xf9   : > { %v829_v48 = vmul.f32 %v827_v41, %v818_v33  ;;  %v845_v39 = vmul.f32 %v843_v49, %v834_v17  ;;  %v970_v33 = vpop.permute.xlu0 %969 }
  0xfa   : > { %v814_v42 = vadd.f32 %v812_v8, %v778_v38  ;;  %v815_v40 = vadd.f32 %v813_v31, %v779_v35  ;;  %v844_v54 = vmul.f32 %v839_v55, %v834_v17 }
  0xfb   : > { %v850_v32 = vpop.permute.xlu1 %849 }
  0xfc   : > { %v830_v52 = vadd.f32 %v828_v4, %v814_v42  ;;  %v831_v53 = vadd.f32 %v829_v48, %v815_v40  ;;  %v860_v51 = vmul.f32 %v855_v26, %v850_v32  ;;  %v861_v1 = vmul.f32 %v859_v27, %v850_v32 }
  0xfd   : > { %v986_v48 = vpop.permute.xlu0 %985 }
  0xfe   : > { %v846_v62 = vadd.f32 %v844_v54, %v830_v52  ;;  %v847_v44 = vadd.f32 %v845_v39, %v831_v53 }
  0xff   : > { %v865_v46 = vpop.permute.xlu1 %864 }
 0x100   : > { %v862_v5 = vadd.f32 %v860_v51, %v846_v62  ;;  %v863_v6 = vadd.f32 %v861_v1, %v847_v44 }
 0x103   : > { %v867_v56 = vpop.permute.xlu1 %866 }
 0x104   : > { %v869_v57 = vsel %vm868_vm6, %v865_v46, %v867_v56  ;;  %v870_v59 = vsel %vm868_vm6, %v867_v56, %v865_v46 }
 0x105   : > { %v879_v60 = vmul.f32 %v874_v20, %v869_v57  ;;  %v880_v61 = vmul.f32 %v878_v47, %v870_v59 }
 0x107   : > { %v918_v63 = vpop.permute.xlu1 %917  ;;  %v891_v0 = vrot.slane %v879_v60, %v1555_v25  ;;  %v895_v58 = vrot.slane %v880_v61, %v1555_v25  ;;  %v907_v7 = vrot.slane %v879_v60, %v1573_v34  ;;  %v911_v9 = vrot.slane %v880_v61, %v1573_v34 }
 0x108   : > { %v923_v15 = vrot.slane %v879_v60, %v1576_v37  ;;  %v927_v11 = vrot.slane %v880_v61, %v1576_v37  ;;  %v939_v30 = vrot.slane %v879_v60, %v1590_v50  ;;  %v943_v29 = vrot.slane %v880_v61, %v1590_v50 }
 0x109   : > { %v896_v45 = vmul.f32 %v891_v0, %v886_v12  ;;  %v897_v3 = vmul.f32 %v895_v58, %v886_v12  ;;  %v912_v17 = vmul.f32 %v907_v7, %v902_v43  ;;  %v913_v16 = vmul.f32 %v911_v9, %v902_v43  ;;  %v1036_v0 = vpop.permute.xlu0 %1035 }
 0x10a   : > { %v928_v23 = vmul.f32 %v923_v15, %v918_v63  ;;  %v929_v21 = vmul.f32 %v927_v11, %v918_v63 }
 0x10b   : > { %v898_v14 = vadd.f32 %v896_v45, %v862_v5  ;;  %v899_v10 = vadd.f32 %v897_v3, %v863_v6 }
 0x10c   : > { %v934_v13 = vpop.permute.xlu1 %933 }
 0x10d   : > { %v914_v2 = vadd.f32 %v912_v17, %v898_v14  ;;  %v915_v19 = vadd.f32 %v913_v16, %v899_v10  ;;  %v944_v41 = vmul.f32 %v939_v30, %v934_v13  ;;  %v945_v42 = vmul.f32 %v943_v29, %v934_v13 }
 0x10f   : > { %v930_v31 = vadd.f32 %v928_v23, %v914_v2  ;;  %v931_v32 = vadd.f32 %v929_v21, %v915_v19 }
 0x110   : > { %v949_v18 = vpop.permute.xlu1 %948 }
 0x111   : > { %v946_v47 = vadd.f32 %v944_v41, %v930_v31  ;;  %v947_v55 = vadd.f32 %v945_v42, %v931_v32 }
 0x114   : > { %v951_v8 = vpop.permute.xlu1 %950 }
 0x115   : > { %v953_v38 = vsel %vm952_vm7, %v949_v18, %v951_v8  ;;  %v954_v22 = vsel %vm952_vm7, %v951_v8, %v949_v18 }
 0x116   : > { %v963_v35 = vmul.f32 %v1178_v24, %v953_v38  ;;  %v964_v36 = vmul.f32 %v1179_v28, %v954_v22 }
 0x118   : > { %v1002_v40 = vpop.permute.xlu1 %1001  ;;  %v975_v46 = vrot.slane %v963_v35, %v1555_v25  ;;  %v979_v20 = vrot.slane %v964_v36, %v1555_v25  ;;  %v991_v49 = vrot.slane %v963_v35, %v1573_v34  ;;  %v995_v4 = vrot.slane %v964_v36, %v1573_v34 }
 0x119   : > { %v1007_v43 = vrot.slane %v963_v35, %v1576_v37  ;;  %v1011_v52 = vrot.slane %v964_v36, %v1576_v37  ;;  %v1023_v25 = vrot.slane %v963_v35, %v1590_v50  ;;  %v1027_v60 = vrot.slane %v964_v36, %v1590_v50 }
 0x11a   : > { %v980_v53 = vmul.f32 %v975_v46, %v970_v33  ;;  %v981_v56 = vmul.f32 %v979_v20, %v970_v33  ;;  %v996_v54 = vmul.f32 %v991_v49, %v986_v48  ;;  %v997_v39 = vmul.f32 %v995_v4, %v986_v48 }
 0x11b   : > { %v1012_v34 = vmul.f32 %v1007_v43, %v1002_v40  ;;  %v1013_v26 = vmul.f32 %v1011_v52, %v1002_v40 }
 0x11c   : > { %v982_v57 = vadd.f32 %v980_v53, %v946_v47  ;;  %v983_v59 = vadd.f32 %v981_v56, %v947_v55 }
 0x11d   : > { %v1018_v61 = vpop.permute.xlu1 %1017 }
 0x11e   : > { %v998_v27 = vadd.f32 %v996_v54, %v982_v57  ;;  %v999_v12 = vadd.f32 %v997_v39, %v983_v59  ;;  %v1028_v37 = vmul.f32 %v1023_v25, %v1018_v61  ;;  %v1029_v62 = vmul.f32 %v1027_v60, %v1018_v61 }
 0x120   : > { %v1014_v44 = vadd.f32 %v1012_v34, %v998_v27  ;;  %v1015_v63 = vadd.f32 %v1013_v26, %v999_v12 }
 0x122   : > { %v1030_v58 = vadd.f32 %v1028_v37, %v1014_v44  ;;  %v1031_v51 = vadd.f32 %v1029_v62, %v1015_v63 }
 0x124   : > { %v1038_v50 = vadd.f32 %v1036_v0, %v1030_v58  ;;  %v1039_v1 = vadd.f32 %v1036_v0, %v1031_v51 }
 0x126   : > { %v1040_v45 = vmax.f32 %v1038_v50, 0.0  ;;  %v1041_v3 = vmax.f32 %v1039_v1, 0.0 }
 0x128   : > { %1042 = vst [vmem:[%s230_s21] sm:$0xff] %v1040_v45  ;;  %1043 = vst [vmem:[%s230_s21 + $0x8] sm:$0xff] %v1041_v3 }
 0x129   : > { %1301 = shalt.err (!%p1298_p5)
}
 0x12a   : > { %s1302_s8 = scalar_lea.hbm %s1725_s29, 256  ;;  %s1306_s11 = scalar_lea.hbm %s1778_s4, 512 }
 0x12b   : > { %p1303_p6 = scmp.ne.s32.totalorder %s1725_s29, %s1302_s8  ;;  %p1307_p10 = scmp.lt.u32.totalorder %s1725_s29, %s1778_s4 }
 0x12c   : > { %p1308_p11 = scmp.lt.u32.totalorder %s1306_s11, %s1302_s8  ;;  %p1310_p13 = scmp.lt.u32.totalorder %s1302_s8, %s1725_s29 }
 0x12d   : > { %p1304_p7 = pnand %p1303_p6, %p1446_p4 }
 0x12e   : > { %p1309_p12 = por %p1308_p11, %p1307_p10 }
 0x12f   : > { %p1305_p9 = pneg %p1304_p7 }
 0x130   : > { %p1311_p0 = por %p1310_p13, %p1309_p12 }
 0x132   : > { %p1312_p1 = pnand %p1311_p0, %p1305_p9 }
 0x134   : > { %1315 = shalt.err (!%p1312_p1)
}
 0x135   : > { %1188 = dma.vmem_to_hbm [thread:$0]  (%p1446_p4), %s1727_s22, 256, %s1725_s29, %s1045_s18  }
 0x136 PF: > { %p1194_p2 = scmp.ge.s32.totalorder %s1366_s20, 2  ;;  %s1073_s14 = sand.u32 1, %s1346_s15  }
 0x137   : > { %s1074_s21 = scalar_lea.sflag [#allocation3], %s1073_s14 }
 0x138   : > { %p1191_p3 = pnand %p1194_p2, %p1453_p8 }
 0x13a   : > { %1341 = dma.done.wait (!%p1191_p3), %s1074_s21, 256  }
 0x13b   : > { %1343 = vsyncadd (!%p1191_p3), %s1074_s21, 4294967040  ;;  %s17_s20 = sadd.s32 1, %s1366_s20   ;;  %s1781_s15 = smov %s1350_s16 }
 0x13c   : > { %p14_p5 = scmp.ge.s32.totalorder %s17_s20, 4   ;;  %s1782_s16 = smov %s1354_s17 }
 0x13d   : > { %s1783_s17 = smov %s1459_s28  ;;  %s1784_s18 = smov %s1362_s19 }
 0x13e   : > { %s1785_s19 = smov %s1787_s23  ;;  %16 = sbr.rel (!%p14_p5) target bundleno = 4 (0x4), region = 85 }
 0x145   :  { %1079 = vsyncpa [#allocation3], 1 }
 0x146   :  { %1081 = vsyncpa [#allocation3 + $0x1], 1 }

</bundles_post_ra>
